<compile_context>
chip_gen: v5e
topology: v5e:2x2
jax: 0.10.0
libtpu: 0.0.40
codegen_flags: <defaults>
</compile_context>

<pallas_src>
import functools

import jax
import jax.numpy as jnp
import numpy as np
from jax.experimental import pallas as pl
from jax.experimental.pallas import tpu as pltpu


def _mvsdpa_kernel(q_ref, k_ref, v_ref, bias_ref, out_ref, attn_ref,
                   *, inv_temperature):
    # q_ref:    (TB, Dk)
    # k_ref:    (TB, L, Dk)
    # v_ref:    (TB, L, Dv)
    # bias_ref: (TB, L)    additive mask bias (0 or -inf)
    # out_ref:  (TB, Dv)
    # attn_ref: (TB, L)
    q = q_ref[...].astype(jnp.float32)      # (TB, Dk)
    k = k_ref[...].astype(jnp.float32)      # (TB, L, Dk)
    v = v_ref[...].astype(jnp.float32)      # (TB, L, Dv)
    bias = bias_ref[...]                    # (TB, L)

    # scores = (q ⊙ k).sum(d_k) / temperature + mask bias     (VPU mul + reduce)
    scores = jnp.sum(q[:, None, :] * k, axis=2) * inv_temperature + bias  # (TB, L)

    # numerically-stable softmax over L (exact divide to stay within 1e-5 tol)
    m = jnp.max(scores, axis=1, keepdims=True)
    e = jnp.exp(scores - m)
    attn = e / jnp.sum(e, axis=1, keepdims=True)                          # (TB, L)

    # TODO(synk): nn.Dropout(attn_dropout) is identity at inference; train-mode
    # dropout would use pltpu.prng_seed / pltpu.prng_random_bits.

    # output = (attn ⊙ v).sum(L)  ->  (TB, Dv)
    out = jnp.sum(attn[:, :, None] * v, axis=1)

    out_ref[...] = out.astype(out_ref.dtype)
    attn_ref[...] = attn.astype(attn_ref.dtype)


def _round_up(x, m):
    return ((x + m - 1) // m) * m


def _choose_block_b(B, L, dk, dv, itemsize=4):
    """Pick a batch tile: multiple of 8, VMEM-budgeted, >= 2 grid steps if possible."""
    # bytes resident in VMEM per batch row (all inputs + outputs), double-buffered
    per_row = (dk + L * dk + L * dv + L + dv + L) * itemsize
    budget = 10 * 1024 * 1024            # safe under 16 MiB (v5e scoped default)
    tb = budget // max(2 * per_row, 1)
    tb = max(8, min(128, (tb // 8) * 8))
    if B > 8:
        # keep at least 2 grid steps so v7x's second TensorCore is used
        tb = min(tb, _round_up(max(B // 2, 8), 8))
    return int(tb)


def mv_scaled_dot_product_attention(q, k, v, temperature, mask=None, *,
                                    block_b=None):
    """q: (B, Dk), k: (B, L, Dk), v: (B, L, Dv), mask: (B, L) bool (True = masked).

    Returns (output (B, Dv), attn (B, L))."""
    B, Dk = q.shape
    _, L, _ = k.shape
    _, _, Dv = v.shape
    out_dtype = v.dtype

    # Convert boolean mask to an additive bias (mirrors masked_fill(mask, -inf)).
    if mask is None:
        bias = jnp.zeros((B, L), dtype=jnp.float32)
    else:
        bias = jnp.where(mask, -jnp.inf, 0.0).astype(jnp.float32)

    tb = block_b if block_b is not None else _choose_block_b(B, L, Dk, Dv)

    # Pad batch to a multiple of the tile (sublane-aligned blocks, clean grid).
    Bp = int(pl.cdiv(B, tb)) * tb
    if Bp != B:
        pad = Bp - B
        q = jnp.pad(q, ((0, pad), (0, 0)))
        k = jnp.pad(k, ((0, pad), (0, 0), (0, 0)))
        v = jnp.pad(v, ((0, pad), (0, 0), (0, 0)))
        bias = jnp.pad(bias, ((0, pad), (0, 0)))

    kernel = functools.partial(_mvsdpa_kernel,
                               inv_temperature=float(1.0 / temperature))

    out, attn = pl.pallas_call(
        kernel,
        out_shape=(
            jax.ShapeDtypeStruct((Bp, Dv), out_dtype),
            jax.ShapeDtypeStruct((Bp, L), out_dtype),
        ),
        grid_spec=pltpu.PrefetchScalarGridSpec(
            num_scalar_prefetch=0,
            grid=(Bp // tb,),
            in_specs=[
                pl.BlockSpec((tb, Dk), lambda i: (i, 0)),       # q
                pl.BlockSpec((tb, L, Dk), lambda i: (i, 0, 0)), # k
                pl.BlockSpec((tb, L, Dv), lambda i: (i, 0, 0)), # v
                pl.BlockSpec((tb, L), lambda i: (i, 0)),        # mask bias
            ],
            out_specs=[
                pl.BlockSpec((tb, Dv), lambda i: (i, 0)),       # output
                pl.BlockSpec((tb, L), lambda i: (i, 0)),        # attn
            ],
        ),
        compiler_params=pltpu.CompilerParams(
            dimension_semantics=("parallel",),
            vmem_limit_bytes=48 * 1024 * 1024,   # < 64 MiB physical on v7x
        ),
    )(q, k, v, bias)

    return out[:B], attn[:B]


def _reference(q, k, v, temperature, mask=None):
    # Pure-JAX reference mirroring the PyTorch module exactly (eval mode).
    attn = jnp.sum(q[:, None, :] * k, axis=2) / temperature
    if mask is not None:
        attn = jnp.where(mask, -jnp.inf, attn)
    attn = jax.nn.softmax(attn, axis=1)
    out = jnp.sum(attn[:, :, None] * v, axis=1)
    return out, attn


if __name__ == "__main__":
    B, L, Dk, Dv = 16, 8, 16, 32            # (n*b, seq_len, d_k, d_v)
    temperature = float(np.sqrt(Dk))

    key = jax.random.PRNGKey(0)
    kq, kk, kv, km = jax.random.split(key, 4)
    q = jax.random.normal(kq, (B, Dk), dtype=jnp.float32)
    k = jax.random.normal(kk, (B, L, Dk), dtype=jnp.float32)
    v = jax.random.normal(kv, (B, L, Dv), dtype=jnp.float32)
    # Boolean mask, True = masked (PyTorch masked_fill convention); keep at
    # least one unmasked position per row to avoid the (PyTorch-matching) NaN.
    mask = jax.random.uniform(km, (B, L)) > 0.7
    mask = mask.at[:, 0].set(False)

    # Masked path.
    out, attn = mv_scaled_dot_product_attention(q, k, v, temperature, mask)
    jax.block_until_ready((out, attn))
    out_ref, attn_ref = _reference(q, k, v, temperature, mask)
    np.testing.assert_allclose(np.asarray(out), np.asarray(out_ref),
                               rtol=1e-5, atol=1e-5)
    np.testing.assert_allclose(np.asarray(attn), np.asarray(attn_ref),
                               rtol=1e-5, atol=1e-5)

    # No-mask path.
    out_nm, attn_nm = mv_scaled_dot_product_attention(q, k, v, temperature, None)
    jax.block_until_ready((out_nm, attn_nm))
    out_nm_ref, attn_nm_ref = _reference(q, k, v, temperature, None)
    np.testing.assert_allclose(np.asarray(out_nm), np.asarray(out_nm_ref),
                               rtol=1e-5, atol=1e-5)
    np.testing.assert_allclose(np.asarray(attn_nm), np.asarray(attn_nm_ref),
                               rtol=1e-5, atol=1e-5)

    # Ragged batch (exercises the padding path: B not a multiple of the tile).
    Br = 11
    out_r, attn_r = mv_scaled_dot_product_attention(
        q[:Br], k[:Br], v[:Br], temperature, mask[:Br])
    jax.block_until_ready((out_r, attn_r))
    out_r_ref, attn_r_ref = _reference(q[:Br], k[:Br], v[:Br], temperature, mask[:Br])
    np.testing.assert_allclose(np.asarray(out_r), np.asarray(out_r_ref),
                               rtol=1e-5, atol=1e-5)
    np.testing.assert_allclose(np.asarray(attn_r), np.asarray(attn_r_ref),
                               rtol=1e-5, atol=1e-5)

    print("KERNEL_OK")
</pallas_src>

<mosaic_0001>
module attributes {stable_mosaic.version = 11 : i64} {
  func.func @_mvsdpa_kernel(%arg0: i32, %arg1: memref<8x16xf32, #tpu.memory_space<vmem>>, %arg2: memref<8x8x16xf32, #tpu.memory_space<vmem>>, %arg3: memref<8x8x32xf32, #tpu.memory_space<vmem>>, %arg4: memref<8x8xf32, #tpu.memory_space<vmem>>, %arg5: memref<8x32xf32, #tpu.memory_space<vmem>>, %arg6: memref<8x8xf32, #tpu.memory_space<vmem>>) attributes {dimension_semantics = [#tpu.dimension_semantics<parallel>], iteration_bounds = array<i64: 2>, scalar_prefetch = 0 : i64, scratch_operands = 0 : i64, tpu.core_type = #tpu.core_type<tc>, window_params = [{transform_indices = @transform_0, window_bounds = array<i64: 8, 16>}, {transform_indices = @transform_1, window_bounds = array<i64: 8, 8, 16>}, {transform_indices = @transform_2, window_bounds = array<i64: 8, 8, 32>}, {transform_indices = @transform_3, window_bounds = array<i64: 8, 8>}, {transform_indices = @transform_4, window_bounds = array<i64: 8, 32>}, {transform_indices = @transform_5, window_bounds = array<i64: 8, 8>}]} {
    %c0 = arith.constant 0 : index
    %c0_0 = arith.constant 0 : index
    %0 = vector.load %arg1[%c0, %c0_0] : memref<8x16xf32, #tpu.memory_space<vmem>>, vector<8x16xf32>
    %c0_1 = arith.constant 0 : index
    %c0_2 = arith.constant 0 : index
    %c0_3 = arith.constant 0 : index
    %1 = vector.load %arg2[%c0_1, %c0_2, %c0_3] : memref<8x8x16xf32, #tpu.memory_space<vmem>>, vector<8x8x16xf32>
    %c0_4 = arith.constant 0 : index
    %c0_5 = arith.constant 0 : index
    %c0_6 = arith.constant 0 : index
    %2 = vector.load %arg3[%c0_4, %c0_5, %c0_6] : memref<8x8x32xf32, #tpu.memory_space<vmem>>, vector<8x8x32xf32>
    %c0_7 = arith.constant 0 : index
    %c0_8 = arith.constant 0 : index
    %3 = vector.load %arg4[%c0_7, %c0_8] : memref<8x8xf32, #tpu.memory_space<vmem>>, vector<8x8xf32>
    %4 = vector.shape_cast %0 : vector<8x16xf32> to vector<8x1x16xf32>
    %5 = vector.broadcast %4 : vector<8x1x16xf32> to vector<8x8x16xf32>
    %6 = arith.mulf %5, %1 : vector<8x8x16xf32>
    %cst = arith.constant dense<0.000000e+00> : vector<8x8xf32>
    %7 = vector.multi_reduction <add>, %6, %cst [2] : vector<8x8x16xf32> to vector<8x8xf32>
    %cst_9 = arith.constant 2.500000e-01 : f32
    %8 = vector.broadcast %cst_9 : f32 to vector<8x8xf32>
    %9 = arith.mulf %7, %8 : vector<8x8xf32>
    %10 = arith.addf %9, %3 : vector<8x8xf32>
    %cst_10 = arith.constant dense<0xFF800000> : vector<8xf32>
    %11 = vector.multi_reduction <maximumf>, %10, %cst_10 [1] : vector<8x8xf32> to vector<8xf32>
    %12 = vector.shape_cast %11 : vector<8xf32> to vector<8x1xf32>
    %13 = vector.broadcast %12 : vector<8x1xf32> to vector<8x8xf32>
    %14 = arith.subf %10, %13 : vector<8x8xf32>
    %15 = math.exp %14 : vector<8x8xf32>
    %cst_11 = arith.constant dense<0.000000e+00> : vector<8xf32>
    %16 = vector.multi_reduction <add>, %15, %cst_11 [1] : vector<8x8xf32> to vector<8xf32>
    %17 = vector.shape_cast %16 : vector<8xf32> to vector<8x1xf32>
    %18 = vector.broadcast %17 : vector<8x1xf32> to vector<8x8xf32>
    %19 = arith.divf %15, %18 : vector<8x8xf32>
    %20 = vector.shape_cast %19 : vector<8x8xf32> to vector<8x8x1xf32>
    %21 = vector.broadcast %20 : vector<8x8x1xf32> to vector<8x8x32xf32>
    %22 = arith.mulf %21, %2 : vector<8x8x32xf32>
    %cst_12 = arith.constant dense<0.000000e+00> : vector<8x32xf32>
    %23 = vector.multi_reduction <add>, %22, %cst_12 [1] : vector<8x8x32xf32> to vector<8x32xf32>
    %c0_13 = arith.constant 0 : index
    %c0_14 = arith.constant 0 : index
    %24 = vector.load %arg5[%c0_13, %c0_14] : memref<8x32xf32, #tpu.memory_space<vmem>>, vector<8x32xf32>
    tpu.vector_store %arg5[%c0_13, %c0_14], %23 {strides = array<i32>} : memref<8x32xf32, #tpu.memory_space<vmem>>, vector<8x32xf32>,
    %c0_15 = arith.constant 0 : index
    %c0_16 = arith.constant 0 : index
    %25 = vector.load %arg6[%c0_15, %c0_16] : memref<8x8xf32, #tpu.memory_space<vmem>>, vector<8x8xf32>
    tpu.vector_store %arg6[%c0_15, %c0_16], %19 {strides = array<i32>} : memref<8x8xf32, #tpu.memory_space<vmem>>, vector<8x8xf32>,
    return
  }
  func.func @transform_0(%arg0: i32) -> (i32, i32) {
    %c0_i32 = arith.constant 0 : i32
    %c0_i32_0 = arith.constant 0 : i32
    return %arg0, %c0_i32 : i32, i32
  }
  func.func @transform_1(%arg0: i32) -> (i32, i32, i32) {
    %c0_i32 = arith.constant 0 : i32
    %c0_i32_0 = arith.constant 0 : i32
    %c0_i32_1 = arith.constant 0 : i32
    return %arg0, %c0_i32, %c0_i32_0 : i32, i32, i32
  }
  func.func @transform_2(%arg0: i32) -> (i32, i32, i32) {
    %c0_i32 = arith.constant 0 : i32
    %c0_i32_0 = arith.constant 0 : i32
    %c0_i32_1 = arith.constant 0 : i32
    return %arg0, %c0_i32, %c0_i32_0 : i32, i32, i32
  }
  func.func @transform_3(%arg0: i32) -> (i32, i32) {
    %c0_i32 = arith.constant 0 : i32
    %c0_i32_0 = arith.constant 0 : i32
    return %arg0, %c0_i32 : i32, i32
  }
  func.func @transform_4(%arg0: i32) -> (i32, i32) {
    %c0_i32 = arith.constant 0 : i32
    %c0_i32_0 = arith.constant 0 : i32
    return %arg0, %c0_i32 : i32, i32
  }
  func.func @transform_5(%arg0: i32) -> (i32, i32) {
    %c0_i32 = arith.constant 0 : i32
    %c0_i32_0 = arith.constant 0 : i32
    return %arg0, %c0_i32 : i32, i32
  }
}

</mosaic_0001>

<bundles_post_ra>
// kernel: tpu_custom_call.1
= control target key start
LH: loop header
LB: loop body
LE: loop exit
PB: predicated region body
PF: predicated region fallthrough
CT: control target
= control target key end

     0   :  { %s1807_s0 = inlined_call_operand.vmem [shape: f32[16,16], index: 0, kind: input, shape index: {}]   ;;  %s1808_s1 = inlined_call_operand.hbm [shape: f32[16,8,16], index: 1, kind: input, shape index: {}]   ;;  %s1809_s2 = inlined_call_operand.hbm [shape: f32[16,8,32], index: 2, kind: input, shape index: {}]   ;;  %s1810_s3 = inlined_call_operand.vmem [shape: f32[16,8], index: 3, kind: input, shape index: {}]   ;;  %s1811_s4 = inlined_call_operand.hbm [shape: f32[16,32], index: 4, kind: output, shape index: {0}]   ;;  %s1812_s5 = inlined_call_operand.vmem [shape: f32[16,8], index: 5, kind: output, shape index: {1}]  }
   0x1   :  { %1822 = sst [smem:[#allocation13_spill]] %s1808_s1 }
   0x2   :  { %11 = vsyncpa [#allocation3], 0 }
   0x3   :  { %13 = vsyncpa [#allocation3 + $0x1], 0 }
   0x4   :  { %14 = vsyncpa [#allocation6], 0 }
   0x5   :  { %16 = vsyncpa [#allocation6 + $0x1], 0 }
   0x6   :  { %17 = vsyncpa [#allocation4], 0 }
   0x7   :  { %19 = vsyncpa [#allocation4 + $0x1], 0  ;;  %s1362_s18 = smov 0   ;;  %s1364_s19 = smov 0  }
   0x8   :  { %s1366_s20 = smov 0   ;;  %s1368_s21 = smov 0  }
   0x9 LB: > { %1823 = sst [smem:[#allocation11_spill]] %s1323_s20  ;;  %s1383_s22 = sadd.s32 4294967295, %s1327_s21   ;;  %s1327_s21 = sphi %s1368_s21, %s1859_s21   ;;  %s1323_s20 = sphi %s1366_s20, %s1856_s20   ;;  %s1319_s19 = sphi %s1364_s19, %s1858_s19   ;;  %s1315_s18 = sphi %s1362_s18, %s1857_s18  }
   0xa   : > { %s1083_s23 = sadd.s32 4294967294, %s1327_s21   ;;  %s1387_s24 = sadd.s32 1, %s1327_s21  }
   0xb   : > { %s58_s25 = sadd.s32 1, %s1323_s20  ;;  %s55_s26 = ssub.s32 %s1327_s21, %s1387_s24 }
   0xc   : > { %p65_p0 = scmp.ne.s32.totalorder %s1323_s20, %s1319_s19  ;;  %p56_p1 = scmp.eq.s32.totalorder %s55_s26, 0 }
   0xd   : > { %p66_p2 = scmp.eq.s32.totalorder %s1327_s21, 0  ;;  %p71_p3 = scmp.ne.s32.totalorder %s1319_s19, %s1315_s18 }
   0xe   : > { %p72_p4 = scmp.eq.s32.totalorder %s1383_s22, 0  ;;  %p147_p7 = scmp.eq.s32.totalorder %s1383_s22, 1 }
   0xf   : > { %s1399_s27 = scalar_select %p56_p1, %s1323_s20, %s58_s25  }
  0x10   : > { %p1401_p5 = por %p66_p2, %p65_p0  ;;  %p1405_p6 = por %p72_p4, %p71_p3 }
  0x11   : > { %1824 = sst [smem:[#allocation12_spill]] %s1399_s27  ;;  %p153_p8 = scmp.eq.s32.totalorder %s1083_s23, 1 }
  0x12   : > { %p1122_p10 = scmp.lt.s32.totalorder %s1327_s21, 2  ;;  %p1412_p11 = por %p147_p7, %p65_p0 }
  0x13   : > { %p1416_p12 = por %p153_p8, %p71_p3  ;;  %s1421_s7 = sand.u32 1, %s1323_s20  }
  0x14   : > { %s1103_s8 = sshll.u32 %s1327_s21, 6  ;;  %s1813_s9 = sshll.u32 %s1421_s7, 6 }
  0x15   : > { %s1829_s1 = sld [smem:[#allocation13_spill]]  ;;  %s210_s14 = scalar_lea.vmem [#allocation2], %s1813_s9 }
  0x16   : > { %s218_s15 = sshll.u32 %s210_s14, 4  ;;  %p1434_p13 = pnand %p1122_p10, %p1401_p5  ;;  %s219_s15 = int_to_ptr.vmem [resolvable:$true] %s218_s15 }
  0x17   : > { %p1092_p0 = scmp.ge.s32.totalorder %s1327_s21, 1  ;;  %p255_p1 = scmp.lt.s32.totalorder %s1327_s21, 3 }
  0x18   : > { %s207_s17 = scalar_lea.sflag [#allocation3], %s1421_s7  ;;  %p1201_p3 = pneg %p1434_p13 }
  0x1b   : > { %s215_s12 = scalar_lea.hbm %s1829_s1, %s1103_s8  ;;  %s1204_s10 = scalar_lea.hbm %s1829_s1, 128 }
  0x1c   : > { %s216_s13 = sshll.u32 %s215_s12, 4  ;;  %s217_s13 = int_to_ptr.hbm [resolvable:$true] %s216_s13 }
  0x1d   : > { %s1197_s23 = sshra.s32 %s217_s13, 4  ;;  %s1198_s23 = int_to_ptr.hbm [resolvable:$true] %s1197_s23 }
  0x1e   : > { %s1199_s25 = scalar_lea.hbm %s1198_s23, 64  ;;  %p1205_p5 = scmp.lt.s32.totalorder %s1198_s23, %s1829_s1 }
  0x1f   : > { %p1200_p2 = scmp.ne.s32.totalorder %s1198_s23, %s1199_s25  ;;  %p1206_p8 = scmp.lt.s32.totalorder %s1204_s10, %s1199_s25 }
  0x21   : > { %p1202_p4 = pnand %p1201_p3, %p1200_p2  ;;  %p1207_p10 = por %p1206_p8, %p1205_p5 }
  0x23   : > { %p1203_p7 = pneg %p1202_p4 }
  0x25   : > { %p1208_p9 = pnand %p1207_p10, %p1203_p7 }
  0x27   : > { %1211 = shalt.err (!%p1208_p9)
}
  0x28   : > { %s1329_s14 = smov 128   ;;  %s1330_s9 = smov 8  }
  0x29   : > { %1114 = dma.hbm_to_vmem [thread:$0]  (!%p1434_p13), %s217_s13, 1024, %s219_s15, %s207_s17, %s1329_s14, %s1329_s14, %s1330_s9  }
  0x2a   : > { %p1458_p2 = pnand %p1092_p0, %p255_p1  ;;  %s237_s28 = scalar_lea.hbm %s1809_s2, %s1103_s8 }
  0x2b   : > { %s238_s10 = sshll.u32 %s237_s28, 4  ;;  %s1832_s11 = sshll.u32 %s1421_s7, 6  ;;  %s239_s10 = int_to_ptr.hbm [resolvable:$true] %s238_s10 }
  0x2c   : > { %s232_s12 = scalar_lea.vmem [#allocation5], %s1832_s11  ;;  %s229_s27 = scalar_lea.sflag [#allocation6], %s1421_s7 }
  0x2d   : > { %s240_s1 = sshll.u32 %s232_s12, 4  ;;  %s1227_s20 = sshra.s32 %s239_s10, 4  ;;  %s241_s1 = int_to_ptr.vmem [resolvable:$true] %s240_s1  ;;  %s1228_s20 = int_to_ptr.hbm [resolvable:$true] %s1227_s20 }
  0x2e   : > { %s1229_s13 = scalar_lea.hbm %s1228_s20, 64  ;;  %s1234_s23 = scalar_lea.hbm %s1809_s2, 128 }
  0x2f   : > { %p1230_p9 = scmp.ne.s32.totalorder %s1228_s20, %s1229_s13  ;;  %p1235_p4 = scmp.lt.s32.totalorder %s1228_s20, %s1809_s2 }
  0x30   : > { %p1236_p7 = scmp.lt.s32.totalorder %s1234_s23, %s1229_s13 }
  0x31   : > { %p1232_p0 = pnand %p1230_p9, %p1201_p3 }
  0x32   : > { %p1237_p5 = por %p1236_p7, %p1235_p4 }
  0x33   : > { %p1233_p1 = pneg %p1232_p0 }
  0x35   : > { %p1238_p8 = pnand %p1237_p5, %p1233_p1 }
  0x37   : > { %1241 = shalt.err (!%p1238_p8)
}
  0x38   : > { %1117 = dma.hbm_to_vmem [thread:$0]  (!%p1434_p13), %s239_s10, 1024, %s241_s1, %s229_s27, %s1329_s14, %s1329_s14, %s1330_s9  }
  0x39   : > { %259 = sbr.rel (%p1458_p2) target bundleno = 965 (0x3c5), region = 36  ;;  %s1484_s7 = sand.u32 (!%p1458_p2), 1, %s1319_s19  }
  0x3a   : > { %s1093_s28 = sshll.u32 (!%p1458_p2), %s1484_s7, 6  ;;  %s262_s11 = scalar_lea.sflag (!%p1458_p2), [#allocation3], %s1484_s7 }
  0x3b   : > { %s1488_s12 = scalar_lea.vmem (!%p1458_p2), [#allocation2], %s1093_s28 }
  0x3e   : > { %1302 = dma.done.wait (%p1405_p6), %s262_s11, 1024  }
  0x3f   : > { %1304 = vsyncadd (%p1405_p6), %s262_s11, 4294966272  ;;  %s272_s1 = scalar_lea.sflag [#allocation6], %s1484_s7  ;;  %s1495_s20 = scalar_lea.vmem [#allocation5], %s1093_s28 }
  0x40   : > { %1306 = dma.done.wait (%p1405_p6), %s272_s1, 1024  }
  0x41   : > { %1308 = vsyncadd (%p1405_p6), %s272_s1, 4294966272  ;;  %p320_p13 = scmp.lt.s32.totalorder %s1383_s22, 1  ;;  %v419_v0 = vlaneseq  ;;  %v335_v3 = vld [vmem:[%s1488_s12] sm:$0xff]  ;;  %vm384_vm0 = vcmask 130048   ;;  %v337_v9 = vld [vmem:[%s1488_s12 + $0x10] sm:$0xff]  ;;  %v1331_v51 = vmov 0  }
  0x42   : > { %v339_v8 = vld [vmem:[%s1488_s12 + $0x20] sm:$0xff]  ;;  %v336_v16 = vld [vmem:[%s1488_s12 + $0x8] sm:$0xff]  ;;  %v341_v22 = vld [vmem:[%s1488_s12 + $0x30] sm:$0xff]  ;;  %vm532_vm1 = vcmask 1041409   ;;  %vm1821_vm2 = vcmask 1042434   ;;  %vm1820_vm3 = vcmask 1043459  }
  0x43   : > { %s321_s27 = scalar_select %p320_p13, %s1383_s22, 1  ;;  %v420_v1 = vshrl.u32 %v419_v0, 7  ;;  %v338_v23 = vld [vmem:[%s1488_s12 + $0x18] sm:$0xff]  ;;  %v340_v34 = vld [vmem:[%s1488_s12 + $0x28] sm:$0xff]  ;;  %vm1819_vm4 = vcmask 1044484   ;;  %vm1818_vm5 = vcmask 1045509  }
  0x44   : > { %v342_v42 = vld [vmem:[%s1488_s12 + $0x38] sm:$0xff]  ;;  %vm1817_vm6 = vcmask 1046534   ;;  %vm1816_vm7 = vcmask 1047559   ;;  %vm1815_vm8 = vcmask 64512   ;;  %s1095_s8 = sshll.u32 %s1484_s7, 3  ;;  %s1100_s25 = sshll.u32 %s1383_s22, 3 }
  0x45   : > { %s1504_s9 = sshll.u32 %s321_s27, 3  ;;  %1159 = vset.pattern.permute.xlu0 %v420_v1  ;;  %1161 = vset.pattern.permute.xlu2 %v420_v1  ;;  %s934_s12 = scalar_lea.hbm %s1811_s4, %s1100_s25 }
  0x46   : > { %s323_s29 = scalar_lea.vmem %s1807_s0, %s1504_s9  ;;  %1160 = vset.pattern.permute.xlu1 %v420_v1  ;;  %s329_s13 = scalar_lea.vmem %s1810_s3, %s1504_s9 }
  0x47   : > { %v334_v2 = vld [vmem:[%s323_s29] sm:$0xff]  ;;  %s333_s23 = scalar_lea.vmem %s1812_s5, %s1504_s9  ;;  %s313_s22 = scalar_lea.vmem [#allocation7], %s1095_s8 }
  0x48   : > { %v360_v4 = vperm.slane %v334_v2, 0  ;;  %v356_v5 = vrot.slane %v334_v2, 4  ;;  %v354_v6 = vrot.slane %v334_v2, 2  ;;  %v353_v7 = vrot.slane %v334_v2, 1  ;;  %v351_v37 = vld [vmem:[%s329_s13] sm:$0xff]  ;;  %s936_s1 = sshll.u32 %s313_s22, 4  ;;  %s937_s1 = int_to_ptr.vmem [resolvable:$true] %s936_s1 }
  0x49   : > { %v358_v10 = vrot.slane %v334_v2, 6  ;;  %v355_v11 = vrot.slane %v334_v2, 3  ;;  %v357_v29 = vrot.slane %v334_v2, 5  ;;  %v425_v38 = vperm.slane %v351_v37, 1  ;;  %s920_s27 = scalar_lea.sflag [#allocation4], %s1484_s7  ;;  %s1277_s26 = scalar_lea.hbm %s1811_s4, 16 }
  0x4a   : > { %v376_v12 = vmul.f32 %v360_v4, %v335_v3  ;;  %v364_v13 = vperm.slane %v356_v5, 0  ;;  %v362_v14 = vperm.slane %v354_v6, 0  ;;  %v361_v15 = vperm.slane %v353_v7, 0 }
  0x4b   : > { %v366_v17 = vperm.slane %v358_v10, 0  ;;  %v363_v21 = vperm.slane %v355_v11, 0  ;;  %v365_v33 = vperm.slane %v357_v29, 0  ;;  %v418_v39 = vperm.slane %v351_v37, 0 }
  0x4c   : > { %v385_v18 = vsel %vm384_vm0, %v376_v12, 0.0  ;;  %v380_v19 = vmul.f32 %v364_v13, %v339_v8  ;;  %v378_v20 = vmul.f32 %v362_v14, %v337_v9  ;;  %v377_v26 = vmul.f32 %v361_v15, %v336_v16 }
  0x4d   : > { %386 = vadd.xlane.f32.xlu0 %v385_v18  ;;  %v382_v27 = vmul.f32 %v366_v17, %v341_v22  ;;  %v379_v28 = vmul.f32 %v363_v21, %v338_v23  ;;  %v381_v35 = vmul.f32 %v365_v33, %v340_v34  ;;  %v359_v40 = vrot.slane %v334_v2, 7 }
  0x4e   : > { %v397_v24 = vsel %vm384_vm0, %v380_v19, 0.0  ;;  %v391_v25 = vsel %vm384_vm0, %v378_v20, 0.0  ;;  %v388_v30 = vsel %vm384_vm0, %v377_v26, 0.0  ;;  %v467_v45 = vperm.slane %v351_v37, 7 }
  0x4f   : > { %398 = vadd.xlane.f32.xlu2 %v397_v24  ;;  %392 = vadd.xlane.f32.xlu1 %v391_v25  ;;  %v403_v31 = vsel %vm384_vm0, %v382_v27, 0.0  ;;  %v394_v32 = vsel %vm384_vm0, %v379_v28, 0.0  ;;  %v400_v36 = vsel %vm384_vm0, %v381_v35, 0.0  ;;  %v367_v41 = vperm.slane %v359_v40, 0 }
  0x50   : > { %v432_v46 = vperm.slane %v351_v37, 2  ;;  %v439_v47 = vperm.slane %v351_v37, 3  ;;  %v446_v48 = vperm.slane %v351_v37, 4  ;;  %v453_v49 = vperm.slane %v351_v37, 5 }
  0x51   : > { %v383_v43 = vmul.f32 %v367_v41, %v342_v42  ;;  %v460_v50 = vperm.slane %v351_v37, 6  ;;  %v1546_v24 = vand.u32 127, %v419_v0 }
  0x53   : > { %v406_v44 = vsel %vm384_vm0, %v383_v43, 0.0 }
  0x55   : > { %389 = vadd.xlane.f32.xlu0 %v388_v30 }
  0x57   : > { %404 = vadd.xlane.f32.xlu2 %v403_v31  ;;  %395 = vadd.xlane.f32.xlu1 %v394_v32 }
  0x5f   : > { %401 = vadd.xlane.f32.xlu1 %v400_v36 }
  0x69   : > { %430 = vperm.xlu0 %1159, %v425_v38  }
  0x6f   : > { %423 = vperm.xlu2 %1161, %v418_v39  }
  0x71   : > { %1164 = vset.pattern.permute.xlu0 %v1331_v51 }
  0x77   : > { %472 = vperm.xlu2 %1161, %v467_v45  }
  0x78   : > { %437 = vperm.xlu1 %1160, %v432_v46  }
  0x7f   : > { %1163 = vset.pattern.permute.xlu2 %v1331_v51 }
  0x80   : > { %444 = vperm.xlu1 %1160, %v439_v47  }
  0x88   : > { %451 = vperm.xlu1 %1160, %v446_v48  }
  0x90   : > { %458 = vperm.xlu1 %1160, %v453_v49  }
  0x93   : > { %407 = vadd.xlane.f32.xlu0 %v406_v44 }
  0x98   : > { %465 = vperm.xlu1 %1160, %v460_v50  }
  0xa0   : > { %1162 = vset.pattern.permute.xlu1 %v1331_v51 }
  0xc0   : > { %v387_v53 = vpop.xlane.xlu0 %386 }
  0xc1   : > { %v409_v56 = vmul.f32 0.25, %v387_v53 }
  0xc2   : > { %v399_v52 = vpop.xlane.xlu2 %398  ;;  %v393_v55 = vpop.xlane.xlu1 %392 }
  0xc3   : > { %v411_v2 = vmul.f32 0.25, %v393_v55  ;;  %v413_v8 = vmul.f32 0.25, %v399_v52 }
  0xc8   : > { %v390_v58 = vpop.xlane.xlu0 %389 }
  0xc9   : > { %v410_v61 = vmul.f32 0.25, %v390_v58 }
  0xca   : > { %v405_v54 = vpop.xlane.xlu2 %404  ;;  %v396_v60 = vpop.xlane.xlu1 %395 }
  0xcb   : > { %v412_v5 = vmul.f32 0.25, %v396_v60  ;;  %v415_v16 = vmul.f32 0.25, %v405_v54 }
  0xd2   : > { %v424_v57 = vpop.permute.xlu2 %423  ;;  %v402_v1 = vpop.xlane.xlu1 %401 }
  0xd3   : > { %v1530_v59 = vadd.f32 %v424_v57, %v409_v56  ;;  %v414_v11 = vmul.f32 0.25, %v402_v1 }
  0xd5   : > { %499 = vperm.xlu1 %1162, %v1530_v59  }
  0xda   : > { %v473_v17 = vpop.permute.xlu2 %472 }
  0xdb   : > { %v431_v62 = vpop.permute.xlu0 %430 }
  0xdc   : > { %v1533_v63 = vadd.f32 %v431_v62, %v410_v61 }
  0xde   : > { %502 = vperm.xlu1 %1162, %v1533_v63  }
  0xea   : > { %v438_v3 = vpop.permute.xlu1 %437 }
  0xeb   : > { %v1536_v4 = vadd.f32 %v438_v3, %v411_v2 }
  0xed   : > { %505 = vperm.xlu1 %1162, %v1536_v4  }
  0xf2   : > { %v445_v6 = vpop.permute.xlu1 %444 }
  0xf3   : > { %v485_v7 = vadd.f32 %v445_v6, %v412_v5 }
  0xf5   : > { %508 = vperm.xlu2 %1163, %v485_v7  }
  0xfa   : > { %v452_v9 = vpop.permute.xlu1 %451 }
  0xfb   : > { %v1539_v10 = vadd.f32 %v452_v9, %v413_v8 }
  0xfd   : > { %511 = vperm.xlu0 %1164, %v1539_v10  }
 0x102   : > { %v459_v12 = vpop.permute.xlu1 %458 }
 0x103   : > { %v487_v13 = vadd.f32 %v459_v12, %v414_v11 }
 0x105   : > { %514 = vperm.xlu1 %1162, %v487_v13  }
 0x106   : > { %v408_v14 = vpop.xlane.xlu0 %407 }
 0x107   : > { %v416_v15 = vmul.f32 0.25, %v408_v14 }
 0x109   : > { %v489_v19 = vadd.f32 %v473_v17, %v416_v15 }
 0x10a   : > { %v466_v18 = vpop.permute.xlu1 %465 }
 0x10b   : > { %v1542_v20 = vadd.f32 %v466_v18, %v415_v16 }
 0x10d   : > { %517 = vperm.xlu2 %1163, %v1542_v20   ;;  %520 = vperm.xlu1 %1162, %v489_v19  }
 0x147   : > { %v500_v21 = vpop.permute.xlu1 %499 }
 0x148   : > { %v524_v28 = vperm.slane %v500_v21, %v1546_v24 }
 0x14f   : > { %v509_v25 = vpop.permute.xlu2 %508 }
 0x150   : > { %v503_v22 = vpop.permute.xlu1 %502  ;;  %v527_v0 = vperm.slane %v509_v25, %v1546_v24 }
 0x151   : > { %v525_v26 = vperm.slane %v503_v22, %v1546_v24 }
 0x153   : > { %v533_v31 = vsel %vm532_vm1, %v525_v26, %v524_v28 }
 0x15f   : > { %v506_v23 = vpop.permute.xlu1 %505 }
 0x160   : > { %v526_v27 = vperm.slane %v506_v23, %v1546_v24 }
 0x162   : > { %v535_v32 = vsel %vm1821_vm2, %v526_v27, %v533_v31 }
 0x163   : > { %v537_v36 = vsel %vm1820_vm3, %v527_v0, %v535_v32 }
 0x167   : > { %v518_v35 = vpop.permute.xlu2 %517 }
 0x168   : > { %v530_v39 = vperm.slane %v518_v35, %v1546_v24 }
 0x16f   : > { %v512_v29 = vpop.permute.xlu0 %511 }
 0x170   : > { %v528_v33 = vperm.slane %v512_v29, %v1546_v24 }
 0x172   : > { %v539_v37 = vsel %vm1819_vm4, %v528_v33, %v537_v36 }
 0x177   : > { %v515_v30 = vpop.permute.xlu1 %514 }
 0x178   : > { %v529_v34 = vperm.slane %v515_v30, %v1546_v24 }
 0x17a   : > { %v541_v38 = vsel %vm1818_vm5, %v529_v34, %v539_v37 }
 0x17b   : > { %v543_v42 = vsel %vm1817_vm6, %v530_v39, %v541_v38 }
 0x17f   : > { %v521_v40 = vpop.permute.xlu1 %520 }
 0x180   : > { %v531_v41 = vperm.slane %v521_v40, %v1546_v24 }
 0x182   : > { %v545_v43 = vsel %vm1816_vm7, %v531_v41, %v543_v42 }
 0x183   : > { %v548_v44 = vsel %vm1815_vm8, %v545_v43, -inf }
 0x184   : > { %549 = vmax.xlane.f32.xlu2 %v548_v44 }
 0x1f7   : > { %v550_v45 = vpop.xlane.xlu2 %549 }
 0x1f8   : > { %v555_v46 = vperm.slane %v550_v45, 3  ;;  %v552_v47 = vperm.slane %v550_v45, 0  ;;  %v557_v50 = vperm.slane %v550_v45, 5  ;;  %v553_v51 = vperm.slane %v550_v45, 1 }
 0x1f9   : > { %v559_v57 = vperm.slane %v550_v45, 7  ;;  %v554_v60 = vperm.slane %v550_v45, 2  ;;  %v558_v9 = vperm.slane %v550_v45, 6 }
 0x1fa   : > { %v571_v48 = vsub.f32 %v485_v7, %v555_v46  ;;  %v568_v49 = vsub.f32 %v1530_v59, %v552_v47  ;;  %v573_v54 = vsub.f32 %v487_v13, %v557_v50  ;;  %v569_v55 = vsub.f32 %v1533_v63, %v553_v51 }
 0x1fb   : > { %v575_v59 = vsub.f32 %v489_v19, %v559_v57  ;;  %v570_v1 = vsub.f32 %v1536_v4, %v554_v60  ;;  %v556_v63 = vperm.slane %v550_v45, 4  ;;  %v574_v12 = vsub.f32 %v1542_v20, %v558_v9 }
 0x1fc   : > { %v582_v52 = vmul.f32 1.442695, %v571_v48  ;;  %v576_v53 = vmul.f32 1.442695, %v568_v49  ;;  %v586_v56 = vmul.f32 1.442695, %v573_v54 }
 0x1fd   : > { %v578_v58 = vmul.f32 1.442695, %v569_v55  ;;  %v590_v2 = vmul.f32 1.442695, %v575_v59  ;;  %v580_v3 = vmul.f32 1.442695, %v570_v1  ;;  %v572_v7 = vsub.f32 %v1539_v10, %v556_v63 }
 0x1fe   : > { %1165 = vpow2.f32 %v582_v52  ;;  %v588_v13 = vmul.f32 1.442695, %v574_v12 }
 0x1ff   : > { %1167 = vpow2.f32 %v576_v53  ;;  %v584_v8 = vmul.f32 1.442695, %v572_v7 }
 0x200   : > { %1169 = vpow2.f32 %v586_v56 }
 0x201   : > { %1171 = vpow2.f32 %v578_v58 }
 0x202   : > { %1173 = vpow2.f32 %v590_v2 }
 0x203   : > { %1175 = vpow2.f32 %v580_v3 }
 0x204   : > { %v1566_v61 = vpop.eup %1165  ;;  %1177 = vpow2.f32 %v584_v8 }
 0x205   : > { %v1568_v62 = vpop.eup %1167  ;;  %610 = vperm.xlu0 %1164, %v1566_v61   ;;  %1179 = vpow2.f32 %v588_v13 }
 0x206   : > { %601 = vperm.xlu1 %1162, %v1568_v62   ;;  %v1573_v5 = vpop.eup %1169 }
 0x207   : > { %v1575_v6 = vpop.eup %1171 }
 0x208   : > { %v1580_v11 = vpop.eup %1173 }
 0x209   : > { %v1582_v4 = vpop.eup %1175 }
 0x20a   : > { %v1587_v14 = vpop.eup %1177 }
 0x20b   : > { %v1590_v10 = vpop.eup %1179 }
 0x20d   : > { %616 = vperm.xlu0 %1164, %v1573_v5  }
 0x20e   : > { %604 = vperm.xlu1 %1162, %v1575_v6  }
 0x215   : > { %622 = vperm.xlu0 %1164, %v1580_v11  }
 0x216   : > { %607 = vperm.xlu1 %1162, %v1582_v4  }
 0x21e   : > { %613 = vperm.xlu1 %1162, %v1587_v14  }
 0x226   : > { %619 = vperm.xlu1 %1162, %v1590_v10  }
 0x277   : > { %v611_v17 = vpop.permute.xlu0 %610 }
 0x278   : > { %v602_v15 = vpop.permute.xlu1 %601  ;;  %v627_v28 = vperm.slane %v611_v17, %v1546_v24 }
 0x279   : > { %v624_v20 = vperm.slane %v602_v15, %v1546_v24 }
 0x27f   : > { %v617_v19 = vpop.permute.xlu0 %616 }
 0x280   : > { %v605_v16 = vpop.permute.xlu1 %604  ;;  %v629_v32 = vperm.slane %v617_v19, %v1546_v24 }
 0x281   : > { %v625_v21 = vperm.slane %v605_v16, %v1546_v24 }
 0x283   : > { %v632_v25 = vsel %vm532_vm1, %v625_v21, %v624_v20 }
 0x287   : > { %v623_v30 = vpop.permute.xlu0 %622 }
 0x288   : > { %v608_v18 = vpop.permute.xlu1 %607  ;;  %v631_v34 = vperm.slane %v623_v30, %v1546_v24 }
 0x289   : > { %v626_v22 = vperm.slane %v608_v18, %v1546_v24 }
 0x28b   : > { %v633_v26 = vsel %vm1821_vm2, %v626_v22, %v632_v25 }
 0x28c   : > { %v634_v29 = vsel %vm1820_vm3, %v627_v28, %v633_v26 }
 0x290   : > { %v614_v23 = vpop.permute.xlu1 %613 }
 0x291   : > { %v628_v27 = vperm.slane %v614_v23, %v1546_v24 }
 0x293   : > { %v635_v31 = vsel %vm1819_vm4, %v628_v27, %v634_v29 }
 0x294   : > { %v636_v35 = vsel %vm1818_vm5, %v629_v32, %v635_v31 }
 0x298   : > { %v620_v33 = vpop.permute.xlu1 %619 }
 0x299   : > { %v630_v0 = vperm.slane %v620_v33, %v1546_v24 }
 0x29b   : > { %v637_v36 = vsel %vm1817_vm6, %v630_v0, %v636_v35 }
 0x29c   : > { %v638_v37 = vsel %vm1816_vm7, %v631_v34, %v637_v36 }
 0x29d   : > { %v640_v38 = vsel %vm1815_vm8, %v638_v37, 0.0 }
 0x29e   : > { %641 = vadd.xlane.f32.xlu2 %v640_v38 }
 0x311   : > { %v642_v39 = vpop.xlane.xlu2 %641 }
 0x312   : > { %v644_v40 = vperm.slane %v642_v39, 0  ;;  %v1609_v41 = vperm.slane %v642_v39, 1  ;;  %v1611_v42 = vperm.slane %v642_v39, 2  ;;  %v1613_v43 = vperm.slane %v642_v39, 3 }
 0x313   : > { %v1615_v44 = vperm.slane %v642_v39, 4  ;;  %v1618_v45 = vperm.slane %v642_v39, 6  ;;  %v1624_v48 = vperm.slane %v642_v39, 5  ;;  %v1629_v54 = vperm.slane %v642_v39, 7 }
 0x314   : > { %1181 = vrcp.f32 %v644_v40  ;;  %v701_v46 = vand.u32 2147483648, %v1611_v42  ;;  %v686_v47 = vand.u32 2147483648, %v1609_v41  ;;  %v684_v49 = vand.u32 2147483647, %v1609_v41 }
 0x315   : > { %1183 = vrcp.f32 %v1609_v41  ;;  %v669_v50 = vand.u32 2147483647, %v644_v40  ;;  %v699_v51 = vand.u32 2147483647, %v1611_v42  ;;  %v671_v52 = vand.u32 2147483648, %v644_v40 }
 0x316   : > { %1185 = vrcp.f32 %v1611_v42  ;;  %vm680_vm9 = vweird.f32 %v1609_v41  ;;  %vm695_vm10 = vweird.f32 %v1611_v42  ;;  %v702_v56 = vor.u32 1.1754944e-38, %v701_v46 }
 0x317   : > { %1187 = vrcp.f32 %v1613_v43  ;;  %v687_v57 = vor.u32 1.1754944e-38, %v686_v47  ;;  %vm665_vm11 = vweird.f32 %v644_v40  ;;  %vm1636_vm12 = vcmp.eq.f32.partialorder %v684_v49, 8.507059e+37 }
 0x318   : > { %1189 = vrcp.f32 %v1615_v44  ;;  %vm1640_vm13 = vcmp.eq.f32.partialorder %v669_v50, 8.507059e+37  ;;  %v731_v3 = vand.u32 2147483648, %v1615_v44  ;;  %vm1648_vm14 = vcmp.eq.f32.partialorder %v699_v51, 8.507059e+37 }
 0x319   : > { %1191 = vrcp.f32 %v1618_v45  ;;  %v672_v12 = vor.u32 1.1754944e-38, %v671_v52  ;;  %vm710_vm15 = vweird.f32 %v1613_v43  ;;  %v714_v17 = vand.u32 2147483647, %v1613_v43 }
 0x31a   : > { %v1182_v53 = vpop.eup %1181  ;;  %1193 = vrcp.f32 %v1624_v48  ;;  %v716_v32 = vand.u32 2147483648, %v1613_v43  ;;  %v729_v50 = vand.u32 2147483647, %v1615_v44  ;;  %v746_v2 = vand.u32 2147483648, %v1624_v48 }
 0x31b   : > { %v1184_v55 = vpop.eup %1183  ;;  %v661_v58 = vmul.f32 %v1182_v53, %v644_v40  ;;  %1195 = vrcp.f32 %v1629_v54  ;;  %vm666_vm0 = vweird.f32 %v1182_v53  ;;  %v744_v8 = vand.u32 2147483647, %v1624_v48 }
 0x31c   : > { %v1186_v60 = vpop.eup %1185  ;;  %v676_v59 = vmul.f32 %v1184_v55, %v1609_v41  ;;  %vm681_vm7 = vweird.f32 %v1184_v55  ;;  %vm667_vm6 = vmor %vm665_vm11, %vm666_vm0  ;;  %vm770_vm0 = vweird.f32 %v1629_v54 }
 0x31d   : > { %v1645_v63 = vpop.eup %1187  ;;  %v691_v7 = vmul.f32 %v1186_v60, %v1611_v42  ;;  %v662_v9 = vsub.f32 1.0, %v661_v58  ;;  %vm696_vm8 = vweird.f32 %v1186_v60  ;;  %vm682_vm4 = vmor %vm680_vm9, %vm681_vm7  ;;  %vm730_vm7 = vcmp.eq.f32.partialorder %v729_v50, 8.507059e+37 }
 0x31e   : > { %v1190_v13 = vpop.eup %1189  ;;  %v677_v15 = vsub.f32 1.0, %v676_v59  ;;  %v706_v16 = vmul.f32 %v1645_v63, %v1613_v43  ;;  %vm711_vm5 = vweird.f32 %v1645_v63  ;;  %vm697_vm2 = vmor %vm695_vm10, %vm696_vm8  ;;  %vm740_vm9 = vweird.f32 %v1624_v48 }
 0x31f   : > { %v692_v18 = vsub.f32 1.0, %v691_v7  ;;  %v663_v19 = vmul.f32 %v1182_v53, %v662_v9  ;;  %v721_v21 = vmul.f32 %v1190_v13, %v1615_v44  ;;  %v1658_v22 = vpop.eup %1191  ;;  %vm726_vm3 = vweird.f32 %v1190_v13 }
 0x320   : > { %v678_v20 = vmul.f32 %v1184_v55, %v677_v15  ;;  %v707_v23 = vsub.f32 1.0, %v706_v16  ;;  %v751_v28 = vmul.f32 %v1658_v22, %v1618_v45  ;;  %v1662_v29 = vpop.eup %1193  ;;  %vm756_vm8 = vweird.f32 %v1658_v22 }
 0x321   : > { %v693_v25 = vmul.f32 %v1186_v60, %v692_v18  ;;  %v664_v26 = vadd.f32 %v1182_v53, %v663_v19  ;;  %v722_v27 = vsub.f32 1.0, %v721_v21  ;;  %v1670_v35 = vpop.eup %1195  ;;  %vm755_vm10 = vweird.f32 %v1618_v45 }
 0x322   : > { %v679_v30 = vadd.f32 %v1184_v55, %v678_v20  ;;  %v708_v31 = vmul.f32 %v1645_v63, %v707_v23  ;;  %v752_v39 = vsub.f32 1.0, %v751_v28  ;;  %v747_v16 = vor.u32 1.1754944e-38, %v746_v2 }
 0x323   : > { %v694_v33 = vadd.f32 %v1186_v60, %v693_v25  ;;  %v668_v0 = vsel %vm667_vm6, %v1182_v53, %v664_v26  ;;  %v723_v34 = vmul.f32 %v1190_v13, %v722_v27  ;;  %v717_v53 = vor.u32 1.1754944e-38, %v716_v32  ;;  %v345_v27 = vld [vmem:[%s1495_s20 + $0x10] sm:$0xff] }
 0x324   : > { %v683_v36 = vsel %vm682_vm4, %v1184_v55, %v679_v30  ;;  %v673_v37 = vsel %vm1640_vm13, %v672_v12, %v668_v0  ;;  %v709_v38 = vadd.f32 %v1645_v63, %v708_v31  ;;  %vm725_vm4 = vweird.f32 %v1615_v44 }
 0x325   : > { %v698_v40 = vsel %vm697_vm2, %v1186_v60, %v694_v33  ;;  %v688_v41 = vsel %vm1636_vm12, %v687_v57, %v683_v36  ;;  %v674_v46 = vmul.f32 %v1568_v62, %v673_v37  ;;  %v724_v47 = vadd.f32 %v1190_v13, %v723_v34  ;;  %vm1690_vm2 = vmor %vm710_vm15, %vm711_vm5  ;;  %v346_v36 = vld [vmem:[%s1495_s20 + $0x18] sm:$0xff] }
 0x326   : > { %v703_v49 = vsel %vm1648_vm14, %v702_v56, %v698_v40  ;;  %v689_v42 = vmul.f32 %v1575_v6, %v688_v41  ;;  %vm727_vm6 = vmor %vm725_vm4, %vm726_vm3  ;;  %v713_v6 = vsel %vm1690_vm2, %v1645_v63, %v709_v38  ;;  %v736_v44 = vmul.f32 %v1662_v29, %v1624_v48  ;;  %v347_v38 = vld [vmem:[%s1495_s20 + $0x20] sm:$0xff] }
 0x327   : > { %v704_v62 = vmul.f32 %v1582_v4, %v703_v49  ;;  %782 = vperm.xlu1 %1162, %v674_v46   ;;  %v728_v52 = vsel %vm727_vm6, %v1190_v13, %v724_v47  ;;  %v753_v43 = vmul.f32 %v1658_v22, %v752_v39  ;;  %v732_v55 = vor.u32 1.1754944e-38, %v731_v3  ;;  %vm757_vm12 = vmor %vm755_vm10, %vm756_vm8 }
 0x328   : > { %787 = vperm.xlu0 %1164, %v689_v42   ;;  %vm715_vm5 = vcmp.eq.f32.partialorder %v714_v17, 8.507059e+37  ;;  %v737_v56 = vsub.f32 1.0, %v736_v44  ;;  %v766_v57 = vmul.f32 %v1670_v35, %v1629_v54  ;;  %v761_v60 = vand.u32 2147483648, %v1618_v45 }
 0x329   : > { %792 = vperm.xlu2 %1163, %v704_v62   ;;  %v718_v4 = vsel %vm715_vm5, %v717_v53, %v713_v6  ;;  %v733_v58 = vsel %vm730_vm7, %v732_v55, %v728_v52  ;;  %vm741_vm3 = vweird.f32 %v1662_v29  ;;  %v754_v1 = vadd.f32 %v1658_v22, %v753_v43 }
 0x32a   : > { %v738_v59 = vmul.f32 %v1662_v29, %v737_v56  ;;  %v767_v3 = vsub.f32 1.0, %v766_v57  ;;  %v719_v63 = vmul.f32 %v1566_v61, %v718_v4  ;;  %v734_v9 = vmul.f32 %v1587_v14, %v733_v58  ;;  %vm742_vm11 = vmor %vm740_vm9, %vm741_vm3  ;;  %v348_v57 = vld [vmem:[%s1495_s20 + $0x28] sm:$0xff] }
 0x32b   : > { %v759_v12 = vand.u32 2147483647, %v1618_v45  ;;  %v758_v61 = vsel %vm757_vm12, %v1658_v22, %v754_v1  ;;  %v762_v17 = vor.u32 1.1754944e-38, %v761_v60  ;;  %vm745_vm13 = vcmp.eq.f32.partialorder %v744_v8, 8.507059e+37  ;;  %v349_v1 = vld [vmem:[%s1495_s20 + $0x30] sm:$0xff] }
 0x32c   : > { %v739_v7 = vadd.f32 %v1662_v29, %v738_v59  ;;  %v768_v15 = vmul.f32 %v1670_v35, %v767_v3  ;;  %vm771_vm15 = vweird.f32 %v1670_v35  ;;  %v776_v45 = vand.u32 2147483648, %v1629_v54 }
 0x32d   : > { %vm760_vm14 = vcmp.eq.f32.partialorder %v759_v12, 8.507059e+37  ;;  %v774_v21 = vand.u32 2147483647, %v1629_v54  ;;  %vm772_vm4 = vmor %vm770_vm0, %vm771_vm15  ;;  %vm828_vm6 = vcmask 261120   ;;  %vm1841_vm5 = vcmask 1042434  }
 0x32e   : > { %v743_v13 = vsel %vm742_vm11, %v1662_v29, %v739_v7  ;;  %v763_v14 = vsel %vm760_vm14, %v762_v17, %v758_v61  ;;  %v769_v18 = vadd.f32 %v1670_v35, %v768_v15  ;;  %v777_v23 = vor.u32 1.1754944e-38, %v776_v45  ;;  %v344_v29 = vld [vmem:[%s1495_s20 + $0x8] sm:$0xff]  ;;  %vm1848_vm12 = vmmov %vm1841_vm5 }
 0x32f   : > { %797 = vperm.xlu1 %1162, %v719_v63   ;;  %v748_v48 = vsel %vm745_vm13, %v747_v16, %v743_v13  ;;  %v764_v22 = vmul.f32 %v1590_v10, %v763_v14  ;;  %vm775_vm2 = vcmp.eq.f32.partialorder %v774_v21, 8.507059e+37  ;;  %vm1842_vm7 = vcmask 1043459  }
 0x330   : > { %802 = vperm.xlu0 %1164, %v734_v9   ;;  %v749_v19 = vmul.f32 %v1573_v5, %v748_v48  ;;  %v773_v20 = vsel %vm772_vm4, %v1670_v35, %v769_v18  ;;  %v343_v5 = vld [vmem:[%s1495_s20] sm:$0xff]  ;;  %vm1843_vm3 = vcmask 1044484   ;;  %vm1844_vm8 = vcmask 1045509   ;;  %vm1849_vm13 = vmmov %vm1842_vm7 }
 0x331   : > { %v778_v25 = vsel %vm775_vm2, %v777_v23, %v773_v20  ;;  %vm1845_vm9 = vcmask 1046534   ;;  %vm1846_vm10 = vcmask 1047559   ;;  %vm1847_vm11 = vcmask 64512   ;;  %vm1851_vm14 = vmmov %vm1844_vm8 }
 0x332   : > { %v779_v26 = vmul.f32 %v1580_v11, %v778_v25  ;;  %vm1852_vm15 = vmmov %vm1845_vm9 }
 0x333   : > { %vm1853_vm0 = vmmov %vm1846_vm10 }
 0x337   : > { %807 = vperm.xlu1 %1162, %v749_v19  }
 0x338   : > { %812 = vperm.xlu0 %1164, %v764_v22  }
 0x33f   : > { %817 = vperm.xlu1 %1162, %v779_v26  }
 0x383   : > { %v793_v28 = vpop.permute.xlu2 %792 }
 0x384   : > { %v822_v31 = vmul.f32 %v793_v28, %v345_v27  ;;  %v904_v58 = vperm.slane %v793_v28, %v1546_v24 }
 0x386   : > { %v843_v11 = vsel %vm828_vm6, %v822_v31, 0.0 }
 0x387   : > { %v844_v41 = vrot.slane %v843_v11, 4 }
 0x389   : > { %v845_v53 = vadd.f32 %v844_v41, %v843_v11 }
 0x38b   : > { %v846_v7 = vrot.slane %v845_v53, 2 }
 0x38d   : > { %v847_v22 = vadd.f32 %v846_v7, %v845_v53 }
 0x399   : > { %v783_v54 = vpop.permute.xlu1 %782 }
 0x39a   : > { %v788_v30 = vpop.permute.xlu0 %787  ;;  %v820_v10 = vmul.f32 %v783_v54, %v343_v5  ;;  %v902_v42 = vperm.slane %v783_v54, %v1546_v24  ;;  %v350_v5 = vld [vmem:[%s1495_s20 + $0x38] sm:$0xff]  ;;  %s938_s20 = sshll.u32 %s934_s12, 4  ;;  %s939_s20 = int_to_ptr.hbm [resolvable:$true] %s938_s20 }
 0x39b   : > { %v821_v32 = vmul.f32 %v788_v30, %v344_v29  ;;  %v903_v49 = vperm.slane %v788_v30, %v1546_v24  ;;  %s1271_s9 = sshra.s32 %s939_s20, 4  ;;  %s1272_s9 = int_to_ptr.hbm [resolvable:$true] %s1271_s9 }
 0x39c   : > { %v829_v33 = vsel %vm828_vm6, %v820_v10, 0.0  ;;  %s1273_s16 = scalar_lea.hbm %s1272_s9, 8  ;;  %p1278_p2 = scmp.lt.s32.totalorder %s1272_s9, %s1811_s4 }
 0x39d   : > { %v836_v0 = vsel %vm828_vm6, %v821_v32, 0.0  ;;  %v830_v34 = vrot.slane %v829_v33, 4  ;;  %v910_v55 = vsel %vm532_vm1, %v903_v49, %v902_v42  ;;  %p1274_p6 = scmp.ne.s32.totalorder %s1272_s9, %s1273_s16  ;;  %p1279_p9 = scmp.lt.s32.totalorder %s1277_s26, %s1273_s16 }
 0x39e   : > { %v837_v35 = vrot.slane %v836_v0, 4  ;;  %v911_v8 = vsel %vm1841_vm5, %v904_v58, %v910_v55 }
 0x39f   : > { %v831_v37 = vadd.f32 %v830_v34, %v829_v33  ;;  %v848_v33 = vrot.slane %v847_v22, 1  ;;  %p1275_p3 = pnand %p1274_p6, %p1412_p11  ;;  %p1280_p0 = por %p1279_p9, %p1278_p2 }
 0x3a0   : > { %v838_v39 = vadd.f32 %v837_v35, %v836_v0 }
 0x3a1   : > { %v798_v40 = vpop.permute.xlu1 %797  ;;  %v832_v51 = vrot.slane %v831_v37, 2  ;;  %v849_v42 = vadd.f32 %v848_v33, %v847_v22  ;;  %p1276_p10 = pneg %p1275_p3 }
 0x3a2   : > { %v803_v46 = vpop.permute.xlu0 %802  ;;  %v823_v47 = vmul.f32 %v798_v40, %v346_v36  ;;  %v839_v6 = vrot.slane %v838_v39, 2  ;;  %v905_v4 = vperm.slane %v798_v40, %v1546_v24 }
 0x3a3   : > { %v824_v50 = vmul.f32 %v803_v46, %v347_v38  ;;  %v833_v60 = vadd.f32 %v832_v51, %v831_v37  ;;  %v906_v13 = vperm.slane %v803_v46, %v1546_v24  ;;  %p1281_p1 = pnand %p1280_p0, %p1276_p10 }
 0x3a4   : > { %v850_v62 = vsel %vm828_vm6, %v823_v47, 0.0  ;;  %v840_v2 = vadd.f32 %v839_v6, %v838_v39  ;;  %v912_v15 = vsel %vm1842_vm7, %v905_v4, %v911_v8 }
 0x3a5   : > { %v857_v44 = vsel %vm828_vm6, %v824_v50, 0.0  ;;  %v851_v52 = vrot.slane %v850_v62, 4  ;;  %v834_v16 = vrot.slane %v833_v60, 1  ;;  %v913_v25 = vsel %vm1843_vm3, %v906_v13, %v912_v15 }
 0x3a6   : > { %v858_v43 = vrot.slane %v857_v44, 4  ;;  %v841_v18 = vrot.slane %v840_v2, 1 }
 0x3a7   : > { %v852_v56 = vadd.f32 %v851_v52, %v850_v62  ;;  %v835_v30 = vadd.f32 %v834_v16, %v833_v60 }
 0x3a8   : > { %v859_v59 = vadd.f32 %v858_v43, %v857_v44  ;;  %v842_v54 = vadd.f32 %v841_v18, %v840_v2 }
 0x3a9   : > { %v853_v3 = vrot.slane %v852_v56, 2  ;;  %v808_v63 = vpop.permute.xlu1 %807 }
 0x3aa   : > { %v813_v9 = vpop.permute.xlu0 %812  ;;  %v825_v12 = vmul.f32 %v808_v63, %v348_v57  ;;  %v860_v17 = vrot.slane %v859_v59, 2  ;;  %v907_v14 = vperm.slane %v808_v63, %v1546_v24  ;;  %v893_v41 = vsel %vm532_vm1, %v842_v54, %v835_v30  ;;  %vm1850_vm1 = vmmov %vm1843_vm3 }
 0x3ab   : > { %v826_v61 = vmul.f32 %v813_v9, %v349_v1  ;;  %v854_v45 = vadd.f32 %v853_v3, %v852_v56  ;;  %v908_v23 = vperm.slane %v813_v9, %v1546_v24  ;;  %v894_v51 = vsel %vm1848_vm12, %v849_v42, %v893_v41 }
 0x3ac   : > { %v864_v48 = vsel %vm828_vm6, %v825_v12, 0.0  ;;  %v861_v27 = vadd.f32 %v860_v17, %v859_v59  ;;  %v914_v29 = vsel %vm1844_vm8, %v907_v14, %v913_v25 }
 0x3ad   : > { %v871_v19 = vsel %vm828_vm6, %v826_v61, 0.0  ;;  %v865_v21 = vrot.slane %v864_v48, 4  ;;  %v855_v10 = vrot.slane %v854_v45, 1  ;;  %v915_v36 = vsel %vm1845_vm9, %v908_v23, %v914_v29 }
 0x3ae   : > { %v872_v20 = vrot.slane %v871_v19, 4  ;;  %v862_v37 = vrot.slane %v861_v27, 1 }
 0x3af   : > { %v866_v26 = vadd.f32 %v865_v21, %v864_v48  ;;  %v856_v46 = vadd.f32 %v855_v10, %v854_v45 }
 0x3b0   : > { %v873_v28 = vadd.f32 %v872_v20, %v871_v19 }
 0x3b1   : > { %v867_v31 = vrot.slane %v866_v26, 2  ;;  %v818_v32 = vpop.permute.xlu1 %817  ;;  %v895_v6 = vsel %vm1849_vm13, %v856_v46, %v894_v51 }
 0x3b2   : > { %v874_v0 = vrot.slane %v873_v28, 2  ;;  %v827_v34 = vmul.f32 %v818_v32, %v350_v5  ;;  %v909_v35 = vperm.slane %v818_v32, %v1546_v24  ;;  %v863_v24 = vadd.f32 %v862_v37, %v861_v27 }
 0x3b3   : > { %v868_v11 = vadd.f32 %v867_v31, %v866_v26 }
 0x3b4   : > { %v875_v38 = vadd.f32 %v874_v0, %v873_v28  ;;  %v878_v39 = vsel %vm828_vm6, %v827_v34, 0.0  ;;  %v916_v40 = vsel %vm1846_vm10, %v909_v35, %v915_v36  ;;  %v896_v55 = vsel %vm1850_vm1, %v863_v24, %v895_v6 }
 0x3b5   : > { %v869_v47 = vrot.slane %v868_v11, 1  ;;  %v879_v49 = vrot.slane %v878_v39, 4  ;;  %918 = vst.msk [vmem:[%s333_s23] sm:$0xff] %vm1847_vm11, %v916_v40 }
 0x3b6   : > { %v876_v62 = vrot.slane %v875_v38, 1 }
 0x3b7   : > { %v880_v50 = vadd.f32 %v879_v49, %v878_v39  ;;  %v870_v44 = vadd.f32 %v869_v47, %v868_v11 }
 0x3b8   : > { %v877_v43 = vadd.f32 %v876_v62, %v875_v38 }
 0x3b9   : > { %v881_v52 = vrot.slane %v880_v50, 2  ;;  %v897_v56 = vsel %vm1851_vm14, %v870_v44, %v896_v55 }
 0x3ba   : > { %v898_v58 = vsel %vm1852_vm15, %v877_v43, %v897_v56 }
 0x3bb   : > { %v882_v53 = vadd.f32 %v881_v52, %v880_v50 }
 0x3bd   : > { %v883_v4 = vrot.slane %v882_v53, 1 }
 0x3bf   : > { %v884_v57 = vadd.f32 %v883_v4, %v882_v53 }
 0x3c1   : > { %v899_v60 = vsel %vm1853_vm0, %v884_v57, %v898_v58 }
 0x3c2   : > { %901 = vst.msk [vmem:[%s313_s22] sm:$0xff] %vm828_vm6, %v899_v60 }
 0x3c3   : > { %1284 = shalt.err (!%p1281_p1)
}
 0x3c4   : > { %1109 = dma.vmem_to_hbm [thread:$0]  (%p1412_p11), %s937_s1, 128, %s939_s20, %s920_s27  }
 0x3c5 PF: > { %s953_s7 = sand.u32 1, %s1315_s18   ;;  %p1854_p4 = scmp.ge.s32.totalorder %s1327_s21, 2 }
 0x3c6   : > { %s954_s15 = scalar_lea.sflag [#allocation4], %s953_s7 }
 0x3c7   : > { %p1119_p7 = pnand %p1854_p4, %p1416_p12 }
 0x3c9   : > { %p1120_p5 = pneg %p1119_p7 }
 0x3cb   : > { %1310 = dma.done.wait (%p1120_p5), %s954_s15, 128  }
 0x3cc   : > { %1312 = vsyncadd (%p1120_p5), %s954_s15, 4294967168  ;;  %s1855_s17 = sld [smem:[#allocation11_spill]]  ;;  %p22_p8 = scmp.ge.s32.totalorder %s1387_s24, 4  }
 0x3cd   : > { %s1856_s20 = sld [smem:[#allocation12_spill]]  ;;  %s1857_s18 = smov %s1319_s19 }
 0x3ce   : > { %s1859_s21 = smov %s1387_s24  ;;  %24 = sbr.rel (!%p22_p8) target bundleno = 9 (0x9), region = 112 }
 0x3d2   : > { %s1858_s19 = smov %s1855_s17 }
 0x3d3   :  { %967 = vsyncpa [#allocation3], 1 }
 0x3d4   :  { %969 = vsyncpa [#allocation3 + $0x1], 1 }
 0x3d5   :  { %970 = vsyncpa [#allocation6], 1 }
 0x3d6   :  { %972 = vsyncpa [#allocation6 + $0x1], 1 }
 0x3d7   :  { %973 = vsyncpa [#allocation4], 1 }
 0x3d8   :  { %975 = vsyncpa [#allocation4 + $0x1], 1 }

</bundles_post_ra>
